<compile_context>
chip_gen: v7x
topology: tpu7x:2x2x1
jax: 0.10.0
libtpu: 0.0.40
codegen_flags: <defaults>
</compile_context>

<pallas_src>
import jax
import jax.numpy as jnp
from jax.experimental import pallas as pl
from jax.experimental.pallas import tpu as pltpu

# Small, module-consistent shapes (hidden_depth = 2 -> 3 Linear layers/head).
OBS_DIM = 16
ACT_DIM = 8
HIDDEN = 32                 # per-head hidden width
IN_DIM = OBS_DIM + ACT_DIM
H2 = 2 * HIDDEN             # fused hidden width (both heads side by side)
BATCH = 8


def doubleq_fused_kernel(obs_ref, act_ref, w1o_ref, w1a_ref, w2_ref, w3_ref,
                         b_ref, out_ref):
    """Both Q heads in one pass.

    obs:  (TB, OBS_DIM)
    act:  (TB, ACT_DIM)
    w1o:  (OBS_DIM, 2H)   obs-rows of [W1_q1 | W1_q2]
    w1a:  (ACT_DIM, 2H)   action-rows of [W1_q1 | W1_q2]
    w2:   (2H, 2H)        block-diag(W2_q1, W2_q2)   (no cross-head mixing)
    w3:   (2H, 2)         col 0 <- W3_q1, col 1 <- W3_q2
    b:    (3, 2H)         row 0 = b1, row 1 = b2, row 2 = [b3_q1, b3_q2, 0..]
    out:  (TB, 2)         q1 in col 0, q2 in col 1
    """
    b = b_ref[...]

    h = (jnp.dot(obs_ref[...], w1o_ref[...], preferred_element_type=jnp.float32)
         + jnp.dot(act_ref[...], w1a_ref[...], preferred_element_type=jnp.float32)
         + b[0:1, :])
    h = jnp.maximum(h, 0.0)

    h = jnp.dot(h, w2_ref[...], preferred_element_type=jnp.float32) + b[1:2, :]
    h = jnp.maximum(h, 0.0)

    q = jnp.dot(h, w3_ref[...], preferred_element_type=jnp.float32) + b[2:3, :2]
    out_ref[...] = q


def double_q_critic(obs, action, fused_params):
    """Small/medium-batch path: grid=() single invocation, everything in VMEM.

    Returns a (B, 2) float32 array: column 0 = q1, column 1 = q2.  Consumers
    should index columns (or take min over the last axis) themselves instead
    of this wrapper emitting two extra slice ops per call.
    """
    w1o, w1a, w2, w3, biases = fused_params
    B = obs.shape[0]
    return pl.pallas_call(
        doubleq_fused_kernel,
        out_shape=jax.ShapeDtypeStruct((B, 2), jnp.float32),
    )(obs, action, w1o, w1a, w2, w3, biases)


def double_q_critic_batched(obs, action, fused_params, *, batch_tile=4096):
    """Large-batch path: tile the batch axis ("parallel"), weights resident.

    For B up to a few thousand prefer `double_q_critic` (no grid at all);
    per-grid-step overhead (~0.35 us) dominates small tiles.
    """
    w1o, w1a, w2, w3, biases = fused_params
    B, obs_dim = obs.shape
    act_dim = action.shape[1]
    h2 = w2.shape[0]
    tb = min(batch_tile, B)
    assert B % tb == 0, "pad the batch to a multiple of batch_tile"

    flops = 2 * B * ((obs_dim + act_dim) * h2 + h2 * h2 + h2 * 2)
    bytes_accessed = 4 * (B * (obs_dim + act_dim)          # activations in
                          + obs_dim * h2 + act_dim * h2    # W1 (split)
                          + h2 * h2 + h2 * 2 + 3 * h2      # W2, W3, biases
                          + B * 2)                         # output

    return pl.pallas_call(
        doubleq_fused_kernel,
        out_shape=jax.ShapeDtypeStruct((B, 2), jnp.float32),
        grid=(B // tb,),
        in_specs=[
            pl.BlockSpec((tb, obs_dim), lambda i: (i, 0)),   # obs streams over batch
            pl.BlockSpec((tb, act_dim), lambda i: (i, 0)),   # action streams over batch
            pl.BlockSpec((obs_dim, h2), lambda i: (0, 0)),   # weights stay resident
            pl.BlockSpec((act_dim, h2), lambda i: (0, 0)),
            pl.BlockSpec((h2, h2), lambda i: (0, 0)),
            pl.BlockSpec((h2, 2), lambda i: (0, 0)),
            pl.BlockSpec((3, h2), lambda i: (0, 0)),
        ],
        out_specs=pl.BlockSpec((tb, 2), lambda i: (i, 0)),
        compiler_params=pltpu.CompilerParams(dimension_semantics=("parallel",)),
        cost_estimate=pl.CostEstimate(flops=flops, transcendentals=0,
                                      bytes_accessed=bytes_accessed),
    )(obs, action, w1o, w1a, w2, w3, biases)


def init_params(key):
    """Per-head params stored in x @ W convention (PyTorch weight is (out, in)).

    util.weight_init uses orthogonal_ weights and zero biases; small random
    biases are used here so the kernel's bias path is actually exercised.
    """
    ortho = jax.nn.initializers.orthogonal()

    def head(k):
        k1, k2, k3, kb = jax.random.split(k, 4)
        w1 = ortho(k1, (HIDDEN, IN_DIM), jnp.float32).T     # (IN_DIM, H)
        w2 = ortho(k2, (HIDDEN, HIDDEN), jnp.float32).T     # (H, H)
        w3 = ortho(k3, (1, HIDDEN), jnp.float32).T          # (H, 1)
        kb1, kb2, kb3 = jax.random.split(kb, 3)
        b1 = 0.1 * jax.random.normal(kb1, (HIDDEN,), jnp.float32)
        b2 = 0.1 * jax.random.normal(kb2, (HIDDEN,), jnp.float32)
        b3 = 0.1 * jax.random.normal(kb3, (1,), jnp.float32)
        return w1, b1, w2, b2, w3, b3

    ka, kb = jax.random.split(key)
    return head(ka), head(kb)


def fuse_params(per_head):
    """Build the fused weight/bias tensors consumed by the kernel.

    W1 is split along its input rows into obs- and action-parts so the kernel
    consumes obs and action directly (no wrapper concat).  The block-diagonal
    W2 fusion is only a win while 2H fits one MXU weight tile (<=256 on
    v6e/v7x, <=128 on v5e); beyond that the zero blocks double layer-2 cost.
    """
    (w1a_, b1a, w2a, b2a, w3a, b3a), (w1b_, b1b, w2b, b2b, w3b, b3b) = per_head
    H = w1a_.shape[1]
    assert 2 * H <= 256, (
        "block-diagonal W2 fusion wastes FLOPs/DMA (and VMEM on v7x) once "
        "2H > one MXU tile; use per-head W2 dots for larger hidden widths")

    w1 = jnp.concatenate([w1a_, w1b_], axis=1)                     # (IN_DIM, 2H)
    w1o = w1[:OBS_DIM, :]                                          # (OBS_DIM, 2H)
    w1a = w1[OBS_DIM:, :]                                          # (ACT_DIM, 2H)

    w2 = jnp.zeros((2 * H, 2 * H), jnp.float32)                    # block-diagonal
    w2 = w2.at[:H, :H].set(w2a).at[H:, H:].set(w2b)

    w3 = jnp.zeros((2 * H, 2), jnp.float32)                        # (2H, 2)
    w3 = w3.at[:H, 0].set(w3a[:, 0]).at[H:, 1].set(w3b[:, 0])

    biases = jnp.zeros((3, 2 * H), jnp.float32)                    # packed biases
    biases = biases.at[0, :H].set(b1a).at[0, H:].set(b1b)
    biases = biases.at[1, :H].set(b2a).at[1, H:].set(b2b)
    biases = biases.at[2, 0].set(b3a[0]).at[2, 1].set(b3b[0])
    return w1o, w1a, w2, w3, biases


def reference(obs, action, per_head):
    """Pure-JAX reference matching the PyTorch forward exactly."""
    x = jnp.concatenate([obs, action], axis=-1)
    qs = []
    for (w1, b1, w2, b2, w3, b3) in per_head:
        h = jnp.maximum(x @ w1 + b1, 0.0)
        h = jnp.maximum(h @ w2 + b2, 0.0)
        qs.append(h @ w3 + b3)
    return qs[0], qs[1]


if __name__ == "__main__":
    key = jax.random.PRNGKey(0)
    k_obs, k_act, k_par, k_obs2, k_act2 = jax.random.split(key, 5)

    per_head = init_params(k_par)
    fused = fuse_params(per_head)

    # Small-batch, grid-less fused path.
    obs = jax.random.normal(k_obs, (BATCH, OBS_DIM), jnp.float32)
    action = jax.random.normal(k_act, (BATCH, ACT_DIM), jnp.float32)
    q = double_q_critic(obs, action, fused)
    q = jax.block_until_ready(q)

    r1, r2 = reference(obs, action, per_head)
    assert q.shape == (BATCH, 2)
    assert jnp.allclose(q[:, 0:1], r1, atol=1e-5, rtol=1e-5)
    assert jnp.allclose(q[:, 1:2], r2, atol=1e-5, rtol=1e-5)

    # Batch-tiled path (batch axis "parallel", weights resident).  batch_tile
    # is overridden small here only to exercise the grid; in production keep
    # the large default (or the grid-less path) per the perf notes.
    B2, TB = 64, 32
    obs2 = jax.random.normal(k_obs2, (B2, OBS_DIM), jnp.float32)
    act2 = jax.random.normal(k_act2, (B2, ACT_DIM), jnp.float32)
    qb = double_q_critic_batched(obs2, act2, fused, batch_tile=TB)
    qb = jax.block_until_ready(qb)

    r1b, r2b = reference(obs2, act2, per_head)
    assert jnp.allclose(qb[:, 0:1], r1b, atol=1e-5, rtol=1e-5)
    assert jnp.allclose(qb[:, 1:2], r2b, atol=1e-5, rtol=1e-5)

    print("KERNEL_OK")
</pallas_src>

<mosaic_0001>
module attributes {stable_mosaic.version = 11 : i64} {
  func.func @doubleq_fused_kernel(%arg0: memref<8x16xf32, #tpu.memory_space<vmem>>, %arg1: memref<8x8xf32, #tpu.memory_space<vmem>>, %arg2: memref<16x64xf32, #tpu.memory_space<vmem>>, %arg3: memref<8x64xf32, #tpu.memory_space<vmem>>, %arg4: memref<64x64xf32, #tpu.memory_space<vmem>>, %arg5: memref<64x2xf32, #tpu.memory_space<vmem>>, %arg6: memref<3x64xf32, #tpu.memory_space<vmem>>, %arg7: memref<8x2xf32, #tpu.memory_space<vmem>>) attributes {dimension_semantics = [], scalar_prefetch = 0 : i64, scratch_operands = 0 : i64, tpu.core_type = #tpu.core_type<tc>} {
    %c0 = arith.constant 0 : index
    %c0_0 = arith.constant 0 : index
    %0 = vector.load %arg6[%c0, %c0_0] : memref<3x64xf32, #tpu.memory_space<vmem>>, vector<3x64xf32>
    %c0_1 = arith.constant 0 : index
    %c0_2 = arith.constant 0 : index
    %1 = vector.load %arg0[%c0_1, %c0_2] : memref<8x16xf32, #tpu.memory_space<vmem>>, vector<8x16xf32>
    %c0_3 = arith.constant 0 : index
    %c0_4 = arith.constant 0 : index
    %2 = vector.load %arg2[%c0_3, %c0_4] : memref<16x64xf32, #tpu.memory_space<vmem>>, vector<16x64xf32>
    %cst = arith.constant dense<0.000000e+00> : vector<8x64xf32>
    %3 = tpu.matmul %1, %2, %cst {dimension_numbers = #tpu.dot_dimension_numbers<[1], [0], [0], [1], [0, 0, 1, 1], [], []>} : vector<8x16xf32>, vector<16x64xf32>, vector<8x64xf32> -> vector<8x64xf32>
    %c0_5 = arith.constant 0 : index
    %c0_6 = arith.constant 0 : index
    %4 = vector.load %arg1[%c0_5, %c0_6] : memref<8x8xf32, #tpu.memory_space<vmem>>, vector<8x8xf32>
    %c0_7 = arith.constant 0 : index
    %c0_8 = arith.constant 0 : index
    %5 = vector.load %arg3[%c0_7, %c0_8] : memref<8x64xf32, #tpu.memory_space<vmem>>, vector<8x64xf32>
    %cst_9 = arith.constant dense<0.000000e+00> : vector<8x64xf32>
    %6 = tpu.matmul %4, %5, %cst_9 {dimension_numbers = #tpu.dot_dimension_numbers<[1], [0], [0], [1], [0, 0, 1, 1], [], []>} : vector<8x8xf32>, vector<8x64xf32>, vector<8x64xf32> -> vector<8x64xf32>
    %7 = arith.addf %3, %6 : vector<8x64xf32>
    %8 = vector.extract_strided_slice %0 {offsets = [0, 0], sizes = [1, 64], strides = [1, 1]} : vector<3x64xf32> to vector<1x64xf32>
    %9 = vector.broadcast %8 : vector<1x64xf32> to vector<8x64xf32>
    %10 = arith.addf %7, %9 : vector<8x64xf32>
    %cst_10 = arith.constant 0.000000e+00 : f32
    %11 = vector.broadcast %cst_10 : f32 to vector<8x64xf32>
    %12 = arith.maximumf %10, %11 : vector<8x64xf32>
    %c0_11 = arith.constant 0 : index
    %c0_12 = arith.constant 0 : index
    %13 = vector.load %arg4[%c0_11, %c0_12] : memref<64x64xf32, #tpu.memory_space<vmem>>, vector<64x64xf32>
    %cst_13 = arith.constant dense<0.000000e+00> : vector<8x64xf32>
    %14 = tpu.matmul %12, %13, %cst_13 {dimension_numbers = #tpu.dot_dimension_numbers<[1], [0], [0], [1], [0, 0, 1, 1], [], []>} : vector<8x64xf32>, vector<64x64xf32>, vector<8x64xf32> -> vector<8x64xf32>
    %15 = vector.extract_strided_slice %0 {offsets = [1, 0], sizes = [1, 64], strides = [1, 1]} : vector<3x64xf32> to vector<1x64xf32>
    %16 = vector.broadcast %15 : vector<1x64xf32> to vector<8x64xf32>
    %17 = arith.addf %14, %16 : vector<8x64xf32>
    %cst_14 = arith.constant 0.000000e+00 : f32
    %18 = vector.broadcast %cst_14 : f32 to vector<8x64xf32>
    %19 = arith.maximumf %17, %18 : vector<8x64xf32>
    %c0_15 = arith.constant 0 : index
    %c0_16 = arith.constant 0 : index
    %20 = vector.load %arg5[%c0_15, %c0_16] : memref<64x2xf32, #tpu.memory_space<vmem>>, vector<64x2xf32>
    %cst_17 = arith.constant dense<0.000000e+00> : vector<8x2xf32>
    %21 = tpu.matmul %19, %20, %cst_17 {dimension_numbers = #tpu.dot_dimension_numbers<[1], [0], [0], [1], [0, 0, 1, 1], [], []>} : vector<8x64xf32>, vector<64x2xf32>, vector<8x2xf32> -> vector<8x2xf32>
    %22 = vector.extract_strided_slice %0 {offsets = [2, 0], sizes = [1, 2], strides = [1, 1]} : vector<3x64xf32> to vector<1x2xf32>
    %23 = vector.broadcast %22 : vector<1x2xf32> to vector<8x2xf32>
    %24 = arith.addf %21, %23 : vector<8x2xf32>
    %c0_18 = arith.constant 0 : index
    %c0_19 = arith.constant 0 : index
    %25 = vector.load %arg7[%c0_18, %c0_19] : memref<8x2xf32, #tpu.memory_space<vmem>>, vector<8x2xf32>
    tpu.vector_store %arg7[%c0_18, %c0_19], %24 {strides = array<i32>} : memref<8x2xf32, #tpu.memory_space<vmem>>, vector<8x2xf32>,
    return
  }
}

</mosaic_0001>

<bundles_post_ra>
// kernel: tpu_custom_call.1
= control target key start
LH: loop header
LB: loop body
LE: loop exit
PB: predicated region body
PF: predicated region fallthrough
CT: control target
= control target key end

     0   :  { %12 = vsyncpa [#allocation3], 0  ;;  %s727_s0 = inlined_call_operand.hbm [shape: f32[8,16], index: 0, kind: input, shape index: {}]   ;;  %s728_s1 = inlined_call_operand.hbm [shape: f32[8,8], index: 1, kind: input, shape index: {}]   ;;  %s729_s2 = inlined_call_operand.vmem [shape: f32[16,64], index: 2, kind: input, shape index: {}]   ;;  %s730_s3 = inlined_call_operand.hbm [shape: f32[8,64], index: 3, kind: input, shape index: {}]   ;;  %s731_s4 = inlined_call_operand.vmem [shape: f32[64,64], index: 4, kind: input, shape index: {}]   ;;  %s732_s5 = inlined_call_operand.vmem [shape: f32[64,2], index: 5, kind: input, shape index: {}]   ;;  %s733_s6 = inlined_call_operand.vmem [shape: f32[3,64], index: 6, kind: input, shape index: {}]   ;;  %s734_s7 = inlined_call_operand.vmem [shape: f32[8,2], index: 7, kind: output, shape index: {}]  }
   0x1   :  { %13 = vsyncpa [#allocation5], 0  ;;  %s581_s24 = smov [#allocation4]   ;;  %s582_s26 = smov [#allocation2]  }
   0x2   :  { %s30_s25 = sshll.u32 %s581_s24, 4  ;;  %s20_s27 = sshll.u32 %s582_s26, 4  ;;  %s31_s25 = int_to_ptr.vmem [resolvable:$true] %s30_s25  ;;  %s21_s27 = int_to_ptr.vmem [resolvable:$true] %s20_s27 }
   0x3   :  { %s511_s30 = scalar_lea.hbm %s728_s1, 128 }
   0x4   :  { %p512_p0 = scmp.ne.s32.totalorder %s728_s1, %s511_s30  ;;  %p515_p1 = scmp.lt.u32.totalorder %s511_s30, %s728_s1 }
   0x6   :  { %p517_p2 = pnand %p515_p1, %p512_p0 }
   0x8   :  { %520 = shalt.err (!%p517_p2)
}
   0x9   :  { %s521_s12 = scalar_lea.vmem %s31_s25, 128  ;;  %p526_p4 = scmp.lt.s32.totalorder %s31_s25, %s31_s25 }
   0xa   :  { %p522_p3 = scmp.ne.s32.totalorder %s31_s25, %s521_s12  ;;  %p527_p5 = scmp.lt.s32.totalorder %s521_s12, %s521_s12 }
   0xc   :  { %p528_p6 = por %p527_p5, %p526_p4 }
   0xe   :  { %p529_p7 = pnand %p528_p6, %p522_p3 }
  0x10   :  { %532 = shalt.err (!%p529_p7)
}
  0x11   :  { %33 = dma.hbm_to_vmem [thread:$0]  %s728_s1, 128, %s31_s25, [#allocation5]  }
  0x12   :  { %s533_s17 = scalar_lea.hbm %s727_s0, 128 }
  0x13   :  { %p534_p8 = scmp.ne.s32.totalorder %s727_s0, %s533_s17  ;;  %p537_p9 = scmp.lt.u32.totalorder %s533_s17, %s727_s0 }
  0x15   :  { %p539_p10 = pnand %p537_p9, %p534_p8 }
  0x17   :  { %542 = shalt.err (!%p539_p10)
}
  0x18   :  { %s543_s22 = scalar_lea.vmem %s21_s27, 128  ;;  %p548_p12 = scmp.lt.s32.totalorder %s21_s27, %s21_s27 }
  0x19   :  { %p544_p11 = scmp.ne.s32.totalorder %s21_s27, %s543_s22  ;;  %p549_p13 = scmp.lt.s32.totalorder %s543_s22, %s543_s22 }
  0x1b   :  { %p550_p0 = por %p549_p13, %p548_p12 }
  0x1d   :  { %p551_p1 = pnand %p550_p0, %p544_p11 }
  0x1f   :  { %554 = shalt.err (!%p551_p1)
}
  0x20   :  { %23 = dma.hbm_to_vmem [thread:$0]  %s727_s0, 128, %s21_s27, [#allocation3]  }
  0x21   :  { %s583_s24 = smov [#allocation6]   ;;  %s555_s29 = scalar_lea.hbm %s730_s3, 128 }
  0x22   :  { %s42_s25 = sshll.u32 %s583_s24, 4  ;;  %p556_p2 = scmp.ne.s32.totalorder %s730_s3, %s555_s29  ;;  %s43_s25 = int_to_ptr.vmem [resolvable:$true] %s42_s25 }
  0x23   :  { %p559_p3 = scmp.lt.u32.totalorder %s555_s29, %s730_s3 }
  0x25   :  { %p561_p4 = pnand %p559_p3, %p556_p2 }
  0x27   :  { %564 = shalt.err (!%p561_p4)
}
  0x28   :  { %s565_s11 = scalar_lea.vmem %s43_s25, 128  ;;  %p570_p6 = scmp.lt.s32.totalorder %s43_s25, %s43_s25 }
  0x29   :  { %p566_p5 = scmp.ne.s32.totalorder %s43_s25, %s565_s11  ;;  %p571_p7 = scmp.lt.s32.totalorder %s565_s11, %s565_s11 }
  0x2b   :  { %p572_p8 = por %p571_p7, %p570_p6 }
  0x2d   :  { %p573_p9 = pnand %p572_p8, %p566_p5 }
  0x2f   :  { %576 = shalt.err (!%p573_p9)
}
  0x30   :  { %45 = dma.hbm_to_vmem [thread:$0]  %s730_s3, 128, %s43_s25, [#allocation5]  }
  0x31   :  { %577 = dma.done.wait [#allocation3], 128  }
  0x32   :  { %578 = vsyncadd [#allocation3], 4294967168 }
  0x33   :  { %579 = dma.done.wait [#allocation5], 256  }
  0x34   :  { %580 = vsyncadd [#allocation5], 4294967040  ;;  %v584_v0 = vmov 0.0|0.0   ;;  %v585_v1 = vmov 0.0   ;;  %vm586_vm0 = vmmov 0   ;;  %vm67_vm1 = vcmask 64512  }
  0x35   :  { %478 = vmatprep.subr.bf16.mxu1 %v584_v0  ;;  %428 = vmatprep.subr.mxu0 %v585_v1  ;;  %v63_v2 = vld [vmem:[%s729_s2] sm:$0xff]  ;;  %v64_v3 = vld [vmem:[%s729_s2 + $0x8] sm:$0xff]  ;;  %v66_v4 = vld [vmem:[#allocation6] sm:$0xff]  ;;  %vm141_vm2 = vcmask 130048   ;;  %v215_v29 = vlaneseq  ;;  %vm233_vm3 = vcmask 523264   ;;  %vm393_vm4 = vcmask 15360  }
  0x36   :  { %430 = vmatprep.mubr.msk.f32.mxu0 %vm586_vm0, %v585_v1  ;;  %437 = vmatprep.mubr.msk.f32.mxu1 %vm586_vm0, %v585_v1  ;;  %v479_v5 = vpack.c.bf16 %v64_v3, %v63_v2  ;;  %v65_v6 = vld [vmem:[#allocation4] sm:$0xff]  ;;  %v221_v7 = vld [vmem:[%s731_s4] sm:$0xff]  ;;  %v223_v9 = vld [vmem:[%s731_s4 + $0x10] sm:$0xff] }
  0x37   :  { %429 = vmatpush3.msra.mxu0 %v66_v4  ;;  %v222_v8 = vld [vmem:[%s731_s4 + $0x8] sm:$0xff]  ;;  %v224_v10 = vld [vmem:[%s731_s4 + $0x18] sm:$0xff]  ;;  %v62_v11 = vld [vmem:[#allocation2] sm:$0xff]  ;;  %v216_v30 = vshrl.u32 %v215_v29, 7 }
  0x38   :  { %431 = vmatmul.mubr.msk.f32.vlgmr.msra.gmra.mrb[0].mxu0 %vm67_vm1, %v65_v6  ;;  %481 = vmatprep.subr.bf16.mxu0 %v584_v0  ;;  %v482_v12 = vpack.c.bf16 %v222_v8, %v221_v7  ;;  %v485_v13 = vpack.c.bf16 %v224_v10, %v223_v9  ;;  %v225_v14 = vld [vmem:[%s731_s4 + $0x20] sm:$0xff]  ;;  %v226_v15 = vld [vmem:[%s731_s4 + $0x28] sm:$0xff]  ;;  %v227_v17 = vld [vmem:[%s731_s4 + $0x30] sm:$0xff] }
  0x39   :  { %480 = vmatpush3.bf16.msra.mxu1 %v479_v5  ;;  %456 = vmatprep.mubr.msk.f32.mxu0 %vm586_vm0, %v585_v1  ;;  %v488_v16 = vpack.c.bf16 %v226_v15, %v225_v14  ;;  %v228_v18 = vld [vmem:[%s731_s4 + $0x38] sm:$0xff]  ;;  %v308_v20 = vld [vmem:[%s732_s5] sm:$0xff]  ;;  %v309_v21 = vld [vmem:[%s732_s5 + $0x8] sm:$0xff]  ;;  %v217_v31 = vsub.s32 0, %v216_v30  ;;  %v231_v44 = vsub.s32 1, %v216_v30  ;;  %v318_v50 = vsub.s32 2, %v216_v30 }
  0x3a   :  { %493 = vmatprep.subr.bf16.mxu1 %v584_v0  ;;  %483 = vmatpush3.bf16.msra.mxu0 %v482_v12  ;;  %v491_v19 = vpack.c.bf16 %v228_v18, %v227_v17  ;;  %v310_v22 = vld [vmem:[%s732_s5 + $0x10] sm:$0xff]  ;;  %v494_v23 = vpack.c.bf16 %v309_v21, %v308_v20  ;;  %v311_v24 = vld [vmem:[%s732_s5 + $0x18] sm:$0xff]  ;;  %v312_v26 = vld [vmem:[%s732_s5 + $0x20] sm:$0xff] }
  0x3b   :  { %484 = vmatprep.subr.bf16.mxu0 %v584_v0  ;;  %v497_v25 = vpack.c.bf16 %v311_v24, %v310_v22  ;;  %v313_v27 = vld [vmem:[%s732_s5 + $0x28] sm:$0xff]  ;;  %v61_v33 = vld [vmem:[%s733_s6] sm:$0x7]  ;;  %v314_v41 = vld [vmem:[%s732_s5 + $0x30] sm:$0xff] }
  0x3c   :  { %438 = vmatmul.mubr.msk.f32.vlgmr.msra.gmra.mrb[0].mxu1 %vm141_vm2, %v62_v11  ;;  %v500_v28 = vpack.c.bf16 %v313_v27, %v312_v26  ;;  %v218_v35 = vrot.slane %v61_v33, %v217_v31  ;;  %v315_v42 = vld [vmem:[%s732_s5 + $0x38] sm:$0xff]  ;;  %v232_v45 = vrot.slane %v61_v33, %v231_v44  ;;  %v319_v51 = vrot.slane %v61_v33, %v318_v50 }
  0x3d   :  { %475 = vmatprep.mubr.msk.f32.mxu1 %vm586_vm0, %v585_v1  ;;  %495 = vmatpush3.bf16.msra.mxu1 %v494_v23  ;;  %v503_v43 = vpack.c.bf16 %v315_v42, %v314_v41 }
  0x3e   :  { %486 = vmatpush3.bf16.msra.mxu0 %v485_v13  ;;  %496 = vmatprep.subr.bf16.mxu1 %v584_v0 }
  0x3f   :  { %487 = vmatprep.subr.bf16.mxu0 %v584_v0 }
  0x41   :  { %498 = vmatpush3.bf16.msra.mxu1 %v497_v25 }
  0x42   :  { %489 = vmatpush3.bf16.msra.mxu0 %v488_v16  ;;  %499 = vmatprep.subr.bf16.mxu1 %v584_v0 }
  0x43   :  { %490 = vmatprep.subr.bf16.mxu0 %v584_v0 }
  0x45   :  { %501 = vmatpush3.bf16.msra.mxu1 %v500_v28 }
  0x46   :  { %492 = vmatpush3.bf16.msra.mxu0 %v491_v19  ;;  %502 = vmatprep.subr.bf16.mxu1 %v584_v0 }
  0x49   :  { %504 = vmatpush3.bf16.msra.mxu1 %v503_v43 }
 0x10b   :  { %v137_v32 = vpop.f32.mrb[0].mxu0 }
 0x10c   :  { %v432_v34 = vpop.f32.mrb[1].mxu0 }
 0x10f   :  { %v211_v36 = vpop.f32.mrb[0].mxu1 }
 0x110   :  { %v212_v37 = vadd.f32 %v211_v36, %v137_v32  ;;  %v439_v38 = vpop.f32.mrb[1].mxu1 }
 0x112   :  { %v219_v39 = vadd.f32 %v218_v35, %v212_v37 }
 0x114   :  { %v220_v40 = vmax.f32 %v219_v39, 0.0 }
 0x116   :  { %457 = vmatmul.mubr.msk.f32.vlgmr.msra.gmra.mrb[2].mxu0 %vm233_vm3, %v220_v40 }
 0x1e9   :  { %v303_v46 = vpop.f32.mrb[2].mxu0 }
 0x1ea   :  { %v304_v47 = vadd.f32 %v303_v46, %v232_v45  ;;  %v458_v48 = vpop.f32.mrb[3].mxu0 }
 0x1ec   :  { %v307_v49 = vmax.f32 %v304_v47, 0.0 }
 0x1ee   :  { %476 = vmatmul.mubr.msk.f32.vlgmr.msra.gmra.mrb[2].mxu1 %vm233_vm3, %v307_v49 }
 0x2c1   :  { %v389_v52 = vpop.f32.mrb[2].mxu1 }
 0x2c2   :  { %v390_v53 = vadd.f32 %v389_v52, %v319_v51  ;;  %v477_v54 = vpop.f32.mrb[3].mxu1 }
 0x2c4   :  { %394 = vst.msk [vmem:[%s734_s7] sm:$0xff] %vm393_vm4, %v390_v53 }
 0x2c5   :  { %399 = vsyncpa [#allocation3], 1 }
 0x2c6   :  { %400 = vsyncpa [#allocation5], 1 }

</bundles_post_ra>
